<compile_context>
chip_gen: v7x
topology: tpu7x:2x2x1
jax: 0.10.0
libtpu: 0.0.40
codegen_flags: <defaults>
</compile_context>

<pallas_src>
import jax
import jax.numpy as jnp
from jax.experimental import pallas as pl
from jax.experimental.pallas import tpu as pltpu

_LANES = 128            # vreg lane width (last dim multiple of 128)
_SUBLANES = 8           # vreg sublane count (second-to-last dim multiple of 8)
_ALIGN = _SUBLANES * _LANES          # 1024-element alignment unit
_BLOCK_BYTES_CAP = 4 << 20           # ~4 MiB of data per grid block


def _mish_math_f32(x):
    """mish(x) = x * tanh(softplus(x)) via a single transcendental.

    With u = exp(x): tanh(log1p(u)) = u*(u + 2) / (u*(u + 2) + 2).
    Clamp x at 20 so u*(u+2) stays finite in f32; for x >= 20 the ratio is 1.0
    to f32 precision, so the clamped formula still returns exactly x.
    For x below ~-87 exp underflows to 0 and the result is 0.0 (true mish is a
    tiny negative ~x*e^x; |error| < 1e-20, benign but note the sign).
    """
    u = jnp.exp(jnp.minimum(x, 20.0))
    n = u * (u + 2.0)
    return x * (n / (n + 2.0))


def _mish_kernel(x_ref, o_ref):
    x = x_ref[...].astype(jnp.float32)
    o_ref[...] = _mish_math_f32(x).astype(o_ref.dtype)


def _round_up(a: int, b: int) -> int:
    return ((a + b - 1) // b) * b


def _mish_jnp(x: jax.Array) -> jax.Array:
    """Plain-jnp fallback for the un-aligned tail / tiny inputs."""
    return _mish_math_f32(x.astype(jnp.float32)).astype(x.dtype)


def mish(x: jax.Array) -> jax.Array:
    """Elementwise Mish via Pallas. Accepts any shape / floating dtype."""
    orig_shape = x.shape
    orig_dtype = x.dtype
    itemsize = jnp.dtype(orig_dtype).itemsize

    total = x.size
    x_flat = x.reshape(-1)

    # Split into a 1024-aligned prefix (Pallas) and a <1024-element tail (jnp).
    aligned = (total // _ALIGN) * _ALIGN
    if aligned == 0:
        # Too small to be worth a kernel launch (and grid would be empty).
        return _mish_jnp(x_flat).reshape(orig_shape)

    prefix = x_flat[:aligned]
    rows = aligned // _LANES                      # multiple of 8 by construction
    x2d = prefix.reshape(rows, _LANES)

    # Rows per block: keep ~_BLOCK_BYTES_CAP bytes per block regardless of
    # dtype (f32 -> 8192 rows, bf16 -> 16384 rows, ...), but force >= 2 grid
    # steps whenever possible so both v7x TensorCores get work.
    tm_cap = max(_SUBLANES, _BLOCK_BYTES_CAP // (_LANES * itemsize))
    if rows >= 2 * _SUBLANES:
        tm = min(tm_cap, _round_up(pl.cdiv(rows, 2), _SUBLANES))
    else:
        tm = rows
    grid = (pl.cdiv(rows, tm),)                   # ragged last block is masked

    n_elems = rows * _LANES
    cost = pl.CostEstimate(
        flops=5 * n_elems,
        transcendentals=n_elems,
        bytes_accessed=2 * n_elems * itemsize,
    )

    out2d = pl.pallas_call(
        _mish_kernel,
        out_shape=jax.ShapeDtypeStruct((rows, _LANES), orig_dtype),
        grid_spec=pltpu.PrefetchScalarGridSpec(
            num_scalar_prefetch=0,
            grid=grid,
            in_specs=[pl.BlockSpec((tm, _LANES), lambda i: (i, 0))],
            out_specs=pl.BlockSpec((tm, _LANES), lambda i: (i, 0)),
        ),
        compiler_params=pltpu.CompilerParams(
            dimension_semantics=("parallel",),
            # 4 MiB blocks x 2 buffers x (in+out) = 16 MiB: fits the 32 MiB
            # scoped limit with headroom even on v7x (64 MiB physical VMEM).
            vmem_limit_bytes=32 << 20,
        ),
        cost_estimate=cost,
    )(x2d)

    out_flat = out2d.reshape(-1)
    if aligned != total:
        tail_out = _mish_jnp(x_flat[aligned:])
        out_flat = jnp.concatenate([out_flat, tail_out])
    return out_flat.reshape(orig_shape)


def mish_ref(x):
    xf = x.astype(jnp.float32)
    # Numerically stable softplus reference: max(x,0) + log1p(exp(-|x|)).
    sp = jnp.maximum(xf, 0.0) + jnp.log1p(jnp.exp(-jnp.abs(xf)))
    return (xf * jnp.tanh(sp)).astype(x.dtype)


if __name__ == "__main__":
    key = jax.random.PRNGKey(0)
    # Small NCHW input consistent with a typical conv-net activation.
    x = jax.random.normal(key, (2, 4, 16, 16), dtype=jnp.float32) * 3.0

    y = mish(x)
    jax.block_until_ready(y)

    y_ref = mish_ref(x)
    assert y.shape == x.shape and y.dtype == x.dtype
    assert jnp.allclose(y, y_ref, atol=1e-5, rtol=1e-5)

    # Also exercise a ragged (non multiple of 1024) size to cover the
    # prefix-kernel + jnp-tail path.
    x2 = jax.random.normal(jax.random.PRNGKey(1), (3, 5, 7, 11), dtype=jnp.float32) * 3.0
    y2 = mish(x2)
    jax.block_until_ready(y2)
    assert jnp.allclose(y2, mish_ref(x2), atol=1e-5, rtol=1e-5)

    print("KERNEL_OK")
</pallas_src>

<mosaic_0001>
module attributes {stable_mosaic.version = 11 : i64} {
  func.func @_mish_kernel(%arg0: i32, %arg1: memref<8x128xf32, #tpu.memory_space<vmem>>, %arg2: memref<8x128xf32, #tpu.memory_space<vmem>>) attributes {dimension_semantics = [#tpu.dimension_semantics<parallel>], iteration_bounds = array<i64: 2>, scalar_prefetch = 0 : i64, scratch_operands = 0 : i64, tpu.core_type = #tpu.core_type<tc>, window_params = [{transform_indices = @transform_0, window_bounds = array<i64: 8, 128>}, {transform_indices = @transform_1, window_bounds = array<i64: 8, 128>}]} {
    %c0 = arith.constant 0 : index
    %c0_0 = arith.constant 0 : index
    %0 = vector.load %arg1[%c0, %c0_0] : memref<8x128xf32, #tpu.memory_space<vmem>>, vector<8x128xf32>
    %cst = arith.constant 2.000000e+01 : f32
    %1 = vector.broadcast %cst : f32 to vector<8x128xf32>
    %2 = arith.minimumf %0, %1 : vector<8x128xf32>
    %3 = math.exp %2 : vector<8x128xf32>
    %cst_1 = arith.constant 2.000000e+00 : f32
    %4 = vector.broadcast %cst_1 : f32 to vector<8x128xf32>
    %5 = arith.addf %3, %4 : vector<8x128xf32>
    %6 = arith.mulf %3, %5 : vector<8x128xf32>
    %cst_2 = arith.constant 2.000000e+00 : f32
    %7 = vector.broadcast %cst_2 : f32 to vector<8x128xf32>
    %8 = arith.addf %6, %7 : vector<8x128xf32>
    %9 = arith.divf %6, %8 : vector<8x128xf32>
    %10 = arith.mulf %0, %9 : vector<8x128xf32>
    %c0_3 = arith.constant 0 : index
    %c0_4 = arith.constant 0 : index
    %11 = vector.load %arg2[%c0_3, %c0_4] : memref<8x128xf32, #tpu.memory_space<vmem>>, vector<8x128xf32>
    tpu.vector_store %arg2[%c0_3, %c0_4], %10 {strides = array<i32>} : memref<8x128xf32, #tpu.memory_space<vmem>>, vector<8x128xf32>,
    return
  }
  func.func @transform_0(%arg0: i32) -> (i32, i32) {
    %c0_i32 = arith.constant 0 : i32
    %c0_i32_0 = arith.constant 0 : i32
    return %arg0, %c0_i32 : i32, i32
  }
  func.func @transform_1(%arg0: i32) -> (i32, i32) {
    %c0_i32 = arith.constant 0 : i32
    %c0_i32_0 = arith.constant 0 : i32
    return %arg0, %c0_i32 : i32, i32
  }
}

</mosaic_0001>

<bundles_post_ra>
// kernel: tpu_custom_call.1
= control target key start
LH: loop header
LB: loop body
LE: loop exit
PB: predicated region body
PF: predicated region fallthrough
CT: control target
= control target key end

     0   :  { %6 = vsyncpa [#allocation3], 0  ;;  %s560_s0 = inlined_call_operand.hbm [shape: f32[16,128], index: 0, kind: input, shape index: {}]   ;;  %s561_s1 = inlined_call_operand.hbm [shape: f32[16,128], index: 1, kind: output, shape index: {}]  }
   0x1   :  { %8 = vsyncpa [#allocation3 + $0x1], 0 }
   0x2   :  { %9 = vsyncpa [#allocation4], 0 }
   0x3   :  { %11 = vsyncpa [#allocation4 + $0x1], 0  ;;  %s399_s6 = smov 0   ;;  %s401_s7 = smov 0  }
   0x4   :  { %s403_s8 = smov 0   ;;  %s405_s9 = smov 0  }
   0x5 LB: > { %s420_s10 = sadd.s32 4294967295, %s385_s9   ;;  %s227_s11 = sadd.s32 4294967294, %s385_s9   ;;  %s385_s9 = sphi %s405_s9, %s576_s9   ;;  %s381_s8 = sphi %s403_s8, %s575_s8   ;;  %s377_s7 = sphi %s401_s7, %s574_s7   ;;  %s373_s6 = sphi %s399_s6, %s573_s6  }
   0x6   : > { %s424_s12 = sadd.s32 1, %s385_s9   ;;  %s24_s13 = sadd.s32 1, %s381_s8 }
   0x7   : > { %s21_s14 = ssub.s32 %s385_s9, %s424_s12  ;;  %p31_p0 = scmp.ne.s32.totalorder %s381_s8, %s377_s7 }
   0x8   : > { %p22_p1 = scmp.eq.s32.totalorder %s21_s14, 0  ;;  %p32_p2 = scmp.eq.s32.totalorder %s385_s9, 0 }
   0x9   : > { %p37_p3 = scmp.ne.s32.totalorder %s377_s7, %s373_s6  ;;  %p38_p4 = scmp.eq.s32.totalorder %s420_s10, 0 }
   0xa   : > { %s436_s15 = scalar_select %p22_p1, %s381_s8, %s24_s13  }
   0xb   : > { %p438_p5 = por %p32_p2, %p31_p0  ;;  %p442_p6 = por %p38_p4, %p37_p3 }
   0xc   : > { %p61_p7 = scmp.eq.s32.totalorder %s420_s10, 1  ;;  %p67_p8 = scmp.eq.s32.totalorder %s227_s11, 1 }
   0xd   : > { %p251_p10 = scmp.lt.s32.totalorder %s385_s9, 2  ;;  %s87_s20 = sand.u32 1, %s381_s8  }
   0xe   : > { %p449_p11 = por %p61_p7, %p31_p0  ;;  %p453_p12 = por %p67_p8, %p37_p3 }
   0xf   : > { %s231_s21 = sshll.u32 %s385_s9, 7  ;;  %s230_s22 = sshll.u32 %s87_s20, 3 }
  0x10   : > { %s565_s18 = scalar_select %p449_p11, 1, 0 }
  0x11   : > { %s566_s19 = scalar_select %p453_p12, 1, 0 }
  0x12   : > { %s462_s25 = scalar_lea.hbm %s560_s0, %s231_s21  ;;  %s91_s26 = scalar_lea.vmem [#allocation2], %s230_s22 }
  0x13   : > { %s98_s27 = sshll.u32 %s91_s26, 4  ;;  %p466_p13 = pnand %p251_p10, %p438_p5  ;;  %s470_s27 = int_to_ptr.vmem [resolvable:$true] %s98_s27 }
  0x14   : > { %s88_s29 = scalar_lea.sflag [#allocation3], %s87_s20  ;;  %s289_s30 = scalar_lea.hbm %s462_s25, 128 }
  0x15   : > { %p290_p2 = scmp.ne.s32.totalorder %s462_s25, %s289_s30  ;;  %p291_p3 = pneg %p466_p13 }
  0x16   : > { %s294_s4 = scalar_lea.hbm %s560_s0, 256  ;;  %p295_p5 = scmp.lt.u32.totalorder %s462_s25, %s560_s0 }
  0x17   : > { %p292_p4 = pnand %p291_p3, %p290_p2  ;;  %p296_p8 = scmp.lt.u32.totalorder %s294_s4, %s289_s30 }
  0x18   : > { %p298_p9 = scmp.lt.u32.totalorder %s289_s30, %s462_s25 }
  0x19   : > { %p293_p7 = pneg %p292_p4  ;;  %p297_p10 = por %p296_p8, %p295_p5 }
  0x1b   : > { %p299_p0 = por %p298_p9, %p297_p10 }
  0x1d   : > { %p300_p1 = pnand %p299_p0, %p293_p7 }
  0x1f   : > { %303 = shalt.err (!%p300_p1)
}
  0x20   : > { %s304_s13 = scalar_lea.vmem %s470_s27, 128  ;;  %s387_s14 = smov [#allocation2]  }
  0x21   : > { %p305_p2 = scmp.ne.s32.totalorder %s470_s27, %s304_s13  ;;  %s309_s16 = sshll.u32 %s387_s14, 4  ;;  %s310_s16 = int_to_ptr.vmem [resolvable:$false] %s309_s16 }
  0x22   : > { %s311_s20 = scalar_lea.vmem %s310_s16, 256  ;;  %p312_p11 = scmp.lt.s32.totalorder %s470_s27, %s310_s16 }
  0x23   : > { %p307_p4 = pnand %p305_p2, %p291_p3  ;;  %p313_p5 = scmp.lt.s32.totalorder %s311_s20, %s304_s13 }
  0x25   : > { %p308_p12 = pneg %p307_p4  ;;  %p314_p8 = por %p313_p5, %p312_p11 }
  0x27   : > { %p315_p9 = pnand %p314_p8, %p308_p12 }
  0x29   : > { %318 = shalt.err (!%p315_p9)
}
  0x2a   : > { %246 = dma.hbm_to_vmem [thread:$0]  (!%p466_p13), %s462_s25, 128, %s470_s27, %s88_s29  }
  0x2b   : > { %p568_p0 = scmp.lt.s32.totalorder %s385_s9, 3  ;;  %p569_p1 = scmp.ge.s32.totalorder %s385_s9, 1 }
  0x2d   : > { %p104_p3 = pnand %p569_p1, %p568_p0 }
  0x2e   : > { %s504_s21 = sand.u32 (!%p104_p3), 1, %s377_s7  }
  0x2f   : > { %107 = sbr.rel (%p104_p3) target bundleno = 106 (0x6a), region = 24  ;;  %s233_s22 = sshll.u32 (!%p104_p3), %s504_s21, 3 }
  0x30   : > { %s110_s23 = scalar_lea.sflag (!%p104_p3), [#allocation3], %s504_s21  ;;  %s113_s24 = scalar_lea.vmem (!%p104_p3), [#allocation2], %s233_s22 }
  0x36   : > { %364 = dma.done.wait (%p442_p6), %s110_s23, 128  }
  0x37   : > { %366 = vsyncadd (%p442_p6), %s110_s23, 4294967168  ;;  %v132_v0 = vld [vmem:[%s113_s24] sm:$0xff]  ;;  %s131_s25 = scalar_lea.vmem [#allocation5], %s233_s22  ;;  %s236_s27 = sshll.u32 %s420_s10, 7 }
  0x38   : > { %v133_v1 = vmin.f32 %v132_v0, 20.0  ;;  %s157_s26 = sshll.u32 %s131_s25, 4  ;;  %s518_s29 = scalar_lea.hbm %s561_s1, %s236_s27  ;;  %s513_s26 = int_to_ptr.vmem [resolvable:$true] %s157_s26 }
  0x39   : > { %s144_s30 = scalar_lea.sflag [#allocation4], %s504_s21  ;;  %s319_s2 = scalar_lea.vmem %s513_s26, 128 }
  0x3a   : > { %v134_v2 = vmul.f32 1.442695, %v133_v1  ;;  %p320_p6 = scmp.ne.s32.totalorder %s513_s26, %s319_s2  ;;  %p570_p11 = scmp.ne.s32.totalorder %s565_s18, 0 }
  0x3b   : > { %s388_s10 = smov [#allocation5]  }
  0x3c   : > { %285 = vpow2.f32 %v134_v2  ;;  %p321_p12 = pnand %p320_p6, %p570_p11  ;;  %s323_s3 = sshll.u32 %s388_s10, 4  ;;  %s324_s3 = int_to_ptr.vmem [resolvable:$false] %s323_s3 }
  0x3d   : > { %s325_s4 = scalar_lea.vmem %s324_s3, 256  ;;  %p326_p7 = scmp.lt.s32.totalorder %s513_s26, %s324_s3 }
  0x3e   : > { %p322_p13 = pneg %p321_p12  ;;  %p327_p10 = scmp.lt.s32.totalorder %s325_s4, %s319_s2 }
  0x40   : > { %p328_p2 = por %p327_p10, %p326_p7 }
  0x42   : > { %p329_p4 = pnand %p328_p2, %p322_p13 }
  0x46   : > { %v286_v3 = vpop.eup %285 }
  0x47   : > { %v136_v4 = vadd.f32 2.0, %v286_v3 }
  0x49   : > { %v137_v5 = vmul.f32 %v286_v3, %v136_v4 }
  0x4b   : > { %v138_v6 = vadd.f32 2.0, %v137_v5 }
  0x4d   : > { %287 = vrcp.f32 %v138_v6 }
  0x57   : > { %v288_v7 = vpop.eup %287 }
  0x58   : > { %v140_v8 = vmul.f32 %v288_v7, %v137_v5 }
  0x5a   : > { %v141_v9 = vmul.f32 %v140_v8, %v132_v0 }
  0x5c   : > { %142 = vst [vmem:[%s131_s25] sm:$0xff] %v141_v9 }
  0x5d   : > { %332 = shalt.err (!%p329_p4)
}
  0x5e   : > { %s333_s5 = scalar_lea.hbm %s518_s29, 128  ;;  %s337_s14 = scalar_lea.hbm %s561_s1, 256 }
  0x5f   : > { %p334_p5 = scmp.ne.s32.totalorder %s518_s29, %s333_s5  ;;  %p338_p0 = scmp.lt.u32.totalorder %s518_s29, %s561_s1 }
  0x60   : > { %p339_p1 = scmp.lt.u32.totalorder %s337_s14, %s333_s5  ;;  %p341_p6 = scmp.lt.u32.totalorder %s333_s5, %s518_s29 }
  0x61   : > { %p335_p8 = pnand %p334_p5, %p570_p11 }
  0x62   : > { %p340_p3 = por %p339_p1, %p338_p0 }
  0x63   : > { %p336_p9 = pneg %p335_p8 }
  0x64   : > { %p342_p12 = por %p341_p6, %p340_p3 }
  0x66   : > { %p343_p13 = pnand %p342_p12, %p336_p9 }
  0x68   : > { %346 = shalt.err (!%p343_p13)
}
  0x69   : > { %241 = dma.vmem_to_hbm [thread:$0]  (%p570_p11), %s513_s26, 128, %s518_s29, %s144_s30  }
  0x6a PF: > { %s169_s21 = sand.u32 1, %s373_s6   ;;  %p571_p7 = scmp.ne.s32.totalorder %s566_s19, 0 }
  0x6b   : > { %p572_p10 = scmp.ge.s32.totalorder %s385_s9, 2  ;;  %s170_s22 = scalar_lea.sflag [#allocation4], %s169_s21 }
  0x6d   : > { %p248_p2 = pnand %p572_p10, %p571_p7 }
  0x6f   : > { %368 = dma.done.wait (!%p248_p2), %s170_s22, 128  }
  0x70   : > { %370 = vsyncadd (!%p248_p2), %s170_s22, 4294967168  ;;  %p14_p4 = scmp.ge.s32.totalorder %s424_s12, 4   ;;  %s573_s6 = smov %s377_s7 }
  0x71   : > { %s574_s7 = smov %s381_s8  ;;  %s575_s8 = smov %s436_s15 }
  0x72   : > { %s576_s9 = smov %s424_s12  ;;  %16 = sbr.rel (!%p14_p4) target bundleno = 5 (0x5), region = 69 }
  0x79   :  { %175 = vsyncpa [#allocation3], 1 }
  0x7a   :  { %177 = vsyncpa [#allocation3 + $0x1], 1 }
  0x7b   :  { %178 = vsyncpa [#allocation4], 1 }
  0x7c   :  { %180 = vsyncpa [#allocation4 + $0x1], 1 }

</bundles_post_ra>
